<compile_context>
chip_gen: v6e
topology: v6e:2x2x1
jax: 0.10.0
libtpu: 0.0.40
codegen_flags: <defaults>
</compile_context>

<pallas_src>
import jax
import jax.numpy as jnp
from jax import lax
from jax.experimental import pallas as pl
from jax.experimental.pallas import tpu as pltpu


def _round_up(x: int, m: int) -> int:
    return ((x + m - 1) // m) * m


def _set_linear_kernel(x_ref, w_ref, b_ref, o_ref):
    # x_ref: [TB, K, fin]   w_ref: [fout_p, fin]   b_ref: [1, fout_p]
    # o_ref: [TB, fout_p]
    k = x_ref.shape[1]
    # Mean-pool over the set dim: accumulate in f32 without materializing an
    # f32 copy of the whole tile; fold 1/K as one scalar multiply afterwards.
    m = jnp.sum(x_ref[...], axis=1, dtype=jnp.float32) * (1.0 / k)      # [TB, fin]
    # Full-length Conv1d == dense matmul on the MXU; contract last dims so no
    # weight transpose is needed in the wrapper.
    y = lax.dot_general(
        m, w_ref[...].astype(jnp.float32),
        dimension_numbers=(((1,), (1,)), ((), ())),
        preferred_element_type=jnp.float32)                             # [TB, fout_p]
    y = y + b_ref[...].astype(jnp.float32)
    # LeakyReLU, default negative_slope = 0.01
    y = jnp.where(y > 0, y, 0.01 * y)
    o_ref[...] = y.astype(o_ref.dtype)


def set_linear_layer_conv1d(feat_set, weight, bias):
    """feat_set: [B, K, fin]; weight: [fout, 1, fin] (PyTorch Conv1d layout); bias: [fout]."""
    B, K, fin = feat_set.shape
    fout = weight.shape[0]

    # Lane-dense output width (unmasked vector stores).
    fout_p = _round_up(fout, 128)

    # Batch tile: multiple of 8 sublanes, capped so the double-buffered x tile
    # plus output tile stays well inside the default scoped-VMEM budget
    # (conservative 24 MiB -> safe even on v7x's 64 MiB / 32 MiB-scoped part).
    itemsize = jnp.dtype(feat_set.dtype).itemsize
    budget = 24 * 1024 * 1024
    TB = min(256, _round_up(B, 8))
    while TB > 8 and (2 * TB * K * fin * itemsize + 2 * TB * fout_p * 4) > budget:
        TB //= 2
    TB = max(8, TB)

    B_p = _round_up(B, TB)
    num_blocks = B_p // TB

    # Pad batch (rows are independent; padded rows are sliced away afterwards)
    # and output-channel dim (zero weight/bias columns -> sliced away).
    x = feat_set
    if B_p != B:
        x = jnp.pad(x, ((0, B_p - B), (0, 0), (0, 0)))
    w = weight.reshape(fout, fin)
    b = bias
    if fout_p != fout:
        w = jnp.pad(w, ((0, fout_p - fout), (0, 0)))
        b = jnp.pad(b, (0, fout_p - fout))
    b = b.reshape(1, fout_p)

    out = pl.pallas_call(
        _set_linear_kernel,
        out_shape=jax.ShapeDtypeStruct((B_p, fout_p), feat_set.dtype),
        grid_spec=pltpu.PrefetchScalarGridSpec(
            num_scalar_prefetch=0,
            grid=(num_blocks,),
            in_specs=[
                pl.BlockSpec((TB, K, fin), lambda i: (i, 0, 0)),   # streamed over B
                pl.BlockSpec((fout_p, fin), lambda i: (0, 0)),     # replicated weight
                pl.BlockSpec((1, fout_p), lambda i: (0, 0)),       # replicated bias
            ],
            out_specs=pl.BlockSpec((TB, fout_p), lambda i: (i, 0)),
        ),
        compiler_params=pltpu.CompilerParams(
            dimension_semantics=("parallel",)),
    )(x, w, b)

    # TODO(synk): if K ever gets large enough that TB*K*fin no longer fits VMEM,
    # add K as a trailing 'arbitrary' reduction grid axis with a VMEM accumulator.
    return out[:B, :fout]


def _reference(feat_set, weight, bias):
    B, K, fin = feat_set.shape
    fout = weight.shape[0]
    m = jnp.sum(feat_set.astype(jnp.float32), axis=1) / K
    y = m @ weight.reshape(fout, fin).T.astype(jnp.float32) + bias.astype(jnp.float32)
    y = jnp.where(y > 0, y, 0.01 * y)
    return y.astype(feat_set.dtype)


if __name__ == "__main__":
    key = jax.random.PRNGKey(0)
    B, K, fin, fout = 2, 8, 32, 64

    k_x, k_w, k_b = jax.random.split(key, 3)
    feat_set = jax.random.normal(k_x, (B, K, fin), dtype=jnp.float32)
    # deterministic parameter init mimicking Conv1d's uniform(-bound, bound)
    bound = 1.0 / (1 * fin) ** 0.5
    weight = jax.random.uniform(k_w, (fout, 1, fin), jnp.float32, -bound, bound)
    bias = jax.random.uniform(k_b, (fout,), jnp.float32, -bound, bound)

    out = set_linear_layer_conv1d(feat_set, weight, bias)
    jax.block_until_ready(out)

    ref = _reference(feat_set, weight, bias)
    assert out.shape == (B, fout)
    assert jnp.allclose(out, ref, atol=1e-5, rtol=1e-5)
    print("KERNEL_OK")
</pallas_src>

<mosaic_0001>
module attributes {stable_mosaic.version = 11 : i64} {
  func.func @_set_linear_kernel(%arg0: i32, %arg1: memref<8x8x32xf32, #tpu.memory_space<vmem>>, %arg2: memref<128x32xf32, #tpu.memory_space<vmem>>, %arg3: memref<1x128xf32, #tpu.memory_space<vmem>>, %arg4: memref<8x128xf32, #tpu.memory_space<vmem>>) attributes {dimension_semantics = [#tpu.dimension_semantics<parallel>], iteration_bounds = array<i64: 1>, scalar_prefetch = 0 : i64, scratch_operands = 0 : i64, tpu.core_type = #tpu.core_type<tc>, window_params = [{transform_indices = @transform_0, window_bounds = array<i64: 8, 8, 32>}, {pipeline_mode = #tpu.pipeline_mode<synchronous>, transform_indices = @transform_1, window_bounds = array<i64: 128, 32>}, {pipeline_mode = #tpu.pipeline_mode<synchronous>, transform_indices = @transform_2, window_bounds = array<i64: 1, 128>}, {transform_indices = @transform_3, window_bounds = array<i64: 8, 128>}]} {
    %c0 = arith.constant 0 : index
    %c0_0 = arith.constant 0 : index
    %c0_1 = arith.constant 0 : index
    %0 = vector.load %arg1[%c0, %c0_0, %c0_1] : memref<8x8x32xf32, #tpu.memory_space<vmem>>, vector<8x8x32xf32>
    %cst = arith.constant dense<0.000000e+00> : vector<8x32xf32>
    %1 = vector.multi_reduction <add>, %0, %cst [1] : vector<8x8x32xf32> to vector<8x32xf32>
    %cst_2 = arith.constant 1.250000e-01 : f32
    %2 = vector.broadcast %cst_2 : f32 to vector<8x32xf32>
    %3 = arith.mulf %1, %2 : vector<8x32xf32>
    %c0_3 = arith.constant 0 : index
    %c0_4 = arith.constant 0 : index
    %4 = vector.load %arg2[%c0_3, %c0_4] : memref<128x32xf32, #tpu.memory_space<vmem>>, vector<128x32xf32>
    %cst_5 = arith.constant dense<0.000000e+00> : vector<8x128xf32>
    %5 = tpu.matmul %3, %4, %cst_5 {dimension_numbers = #tpu.dot_dimension_numbers<[1], [1], [0], [0], [0, 0, 1, 0], [], []>} : vector<8x32xf32>, vector<128x32xf32>, vector<8x128xf32> -> vector<8x128xf32>
    %c0_6 = arith.constant 0 : index
    %c0_7 = arith.constant 0 : index
    %6 = vector.load %arg3[%c0_6, %c0_7] : memref<1x128xf32, #tpu.memory_space<vmem>>, vector<1x128xf32>
    %7 = vector.broadcast %6 : vector<1x128xf32> to vector<8x128xf32>
    %8 = arith.addf %5, %7 : vector<8x128xf32>
    %cst_8 = arith.constant 0.000000e+00 : f32
    %9 = vector.broadcast %cst_8 : f32 to vector<8x128xf32>
    %10 = arith.cmpf ogt, %8, %9 : vector<8x128xf32>
    %cst_9 = arith.constant 0.00999999977 : f32
    %11 = vector.broadcast %cst_9 : f32 to vector<8x128xf32>
    %12 = arith.mulf %11, %8 : vector<8x128xf32>
    %13 = arith.select %10, %8, %12 : vector<8x128xi1>, vector<8x128xf32>
    %c0_10 = arith.constant 0 : index
    %c0_11 = arith.constant 0 : index
    %14 = vector.load %arg4[%c0_10, %c0_11] : memref<8x128xf32, #tpu.memory_space<vmem>>, vector<8x128xf32>
    tpu.vector_store %arg4[%c0_10, %c0_11], %13 {strides = array<i32>} : memref<8x128xf32, #tpu.memory_space<vmem>>, vector<8x128xf32>,
    return
  }
  func.func @transform_0(%arg0: i32) -> (i32, i32, i32) {
    %c0_i32 = arith.constant 0 : i32
    %c0_i32_0 = arith.constant 0 : i32
    %c0_i32_1 = arith.constant 0 : i32
    return %arg0, %c0_i32, %c0_i32_0 : i32, i32, i32
  }
  func.func @transform_1(%arg0: i32) -> (i32, i32) {
    %c0_i32 = arith.constant 0 : i32
    %c0_i32_0 = arith.constant 0 : i32
    %c0_i32_1 = arith.constant 0 : i32
    return %c0_i32, %c0_i32_0 : i32, i32
  }
  func.func @transform_2(%arg0: i32) -> (i32, i32) {
    %c0_i32 = arith.constant 0 : i32
    %c0_i32_0 = arith.constant 0 : i32
    %c0_i32_1 = arith.constant 0 : i32
    return %c0_i32, %c0_i32_0 : i32, i32
  }
  func.func @transform_3(%arg0: i32) -> (i32, i32) {
    %c0_i32 = arith.constant 0 : i32
    %c0_i32_0 = arith.constant 0 : i32
    return %arg0, %c0_i32 : i32, i32
  }
}

</mosaic_0001>

<bundles_post_ra>
// kernel: tpu_custom_call.1
= control target key start
LH: loop header
LB: loop body
LE: loop exit
PB: predicated region body
PF: predicated region fallthrough
CT: control target
= control target key end

     0   :  { %vm23_vm0 = vcmask 261120   ;;  %v366_v1 = vmov 0.0   ;;  %vm367_vm1 = vmmov 0   ;;  %s509_s0 = inlined_call_operand.vmem [shape: f32[8,8,32], index: 0, kind: input, shape index: {}]   ;;  %s510_s1 = inlined_call_operand.vmem [shape: f32[128,32], index: 1, kind: input, shape index: {}]   ;;  %s511_s2 = inlined_call_operand.vmem [shape: f32[1,128], index: 2, kind: input, shape index: {}]   ;;  %s512_s3 = inlined_call_operand.hbm [shape: f32[8,128], index: 3, kind: output, shape index: {}]  }
   0x1   :  { %v103_v0 = vld [vmem:[%s510_s1 + $0x78] sm:$0xff]  ;;  %306 = vmatprep.subr.mxu0 %v366_v1  ;;  %338 = vmatprep.mubr.msk.f32.mxu0 %vm367_vm1, %v366_v1  ;;  %v102_v2 = vld [vmem:[%s510_s1 + $0x70] sm:$0xff]  ;;  %v101_v3 = vld [vmem:[%s510_s1 + $0x68] sm:$0xff] }
   0x2   :  { %307 = vmatpush3.xpose.msk.msra.mxu0 %vm23_vm0, %v103_v0 }
   0x3   :  { %308 = vmatprep.subr.mxu0 %v366_v1 }
   0x6   :  { %309 = vmatpush3.xpose.msk.msra.mxu0 %vm23_vm0, %v102_v2 }
   0x7   :  { %310 = vmatprep.subr.mxu0 %v366_v1 }
   0x8   :  { %8 = vsyncpa [#allocation3], 0  ;;  %v15_v4 = vld [vmem:[%s509_s0] sm:$0xff]  ;;  %v16_v5 = vld [vmem:[%s509_s0 + $0x8] sm:$0xff]  ;;  %vm119_vm2 = vcmask 1041409   ;;  %vm121_vm3 = vcmask 1042434  }
   0x9   :  { %v100_v6 = vld [vmem:[%s510_s1 + $0x60] sm:$0xff]  ;;  %v17_v7 = vld [vmem:[%s509_s0 + $0x10] sm:$0xff]  ;;  %v24_v8 = vsel %vm23_vm0, %v15_v4, 0.0  ;;  %v31_v9 = vsel %vm23_vm0, %v16_v5, 0.0  ;;  %v99_v10 = vld [vmem:[%s510_s1 + $0x58] sm:$0xff]  ;;  %vm123_vm4 = vcmask 1043459  }
   0xa   :  { %311 = vmatpush3.xpose.msk.msra.mxu0 %vm23_vm0, %v101_v3  ;;  %v18_v11 = vld [vmem:[%s509_s0 + $0x18] sm:$0xff]  ;;  %v25_v12 = vrot.slane %v24_v8, 4  ;;  %v32_v13 = vrot.slane %v31_v9, 4  ;;  %v38_v14 = vsel %vm23_vm0, %v17_v7, 0.0  ;;  %v98_v15 = vld [vmem:[%s510_s1 + $0x50] sm:$0xff]  ;;  %v19_v16 = vld [vmem:[%s509_s0 + $0x20] sm:$0xff] }
   0xb   :  { %312 = vmatprep.subr.mxu0 %v366_v1  ;;  %v39_v17 = vrot.slane %v38_v14, 4  ;;  %v45_v18 = vsel %vm23_vm0, %v18_v11, 0.0  ;;  %v20_v21 = vld [vmem:[%s509_s0 + $0x28] sm:$0xff]  ;;  %v52_v23 = vsel %vm23_vm0, %v19_v16, 0.0  ;;  %v21_v28 = vld [vmem:[%s509_s0 + $0x30] sm:$0xff]  ;;  %v96_v32 = vld [vmem:[%s510_s1 + $0x40] sm:$0xff] }
   0xc   :  { %v26_v19 = vadd.f32 %v25_v12, %v24_v8  ;;  %v33_v20 = vadd.f32 %v32_v13, %v31_v9  ;;  %v46_v22 = vrot.slane %v45_v18, 4  ;;  %v97_v24 = vld [vmem:[%s510_s1 + $0x48] sm:$0xff]  ;;  %v53_v29 = vrot.slane %v52_v23, 4  ;;  %v22_v34 = vld [vmem:[%s509_s0 + $0x38] sm:$0xff]  ;;  %v94_v51 = vld [vmem:[%s510_s1 + $0x30] sm:$0xff]  ;;  %s368_s7 = smov [#allocation2]  }
   0xd   :  { %v40_v25 = vadd.f32 %v39_v17, %v38_v14  ;;  %v59_v30 = vsel %vm23_vm0, %v20_v21, 0.0  ;;  %v66_v38 = vsel %vm23_vm0, %v21_v28, 0.0  ;;  %v95_v41 = vld [vmem:[%s510_s1 + $0x38] sm:$0xff]  ;;  %v73_v44 = vsel %vm23_vm0, %v22_v34, 0.0  ;;  %v93_v60 = vld [vmem:[%s510_s1 + $0x28] sm:$0xff]  ;;  %v90_v21 = vld [vmem:[%s510_s1 + $0x10] sm:$0xff] }
   0xe   :  { %313 = vmatpush3.xpose.msk.msra.mxu0 %vm23_vm0, %v100_v6  ;;  %v27_v26 = vrot.slane %v26_v19, 2  ;;  %v34_v27 = vrot.slane %v33_v20, 2  ;;  %v47_v31 = vadd.f32 %v46_v22, %v45_v18  ;;  %v60_v37 = vrot.slane %v59_v30, 4  ;;  %v92_v6 = vld [vmem:[%s510_s1 + $0x20] sm:$0xff]  ;;  %v91_v14 = vld [vmem:[%s510_s1 + $0x18] sm:$0xff]  ;;  %s263_s8 = sshll.u32 %s368_s7, 4  ;;  %s264_s8 = int_to_ptr.vmem [resolvable:$true] %s263_s8 }
   0xf   :  { %314 = vmatprep.subr.mxu0 %v366_v1  ;;  %v41_v33 = vrot.slane %v40_v25, 2  ;;  %v54_v39 = vadd.f32 %v53_v29, %v52_v23  ;;  %v67_v43 = vrot.slane %v66_v38, 4  ;;  %v74_v50 = vrot.slane %v73_v44, 4  ;;  %p349_p1 = scmp.lt.s32.totalorder %s264_s8, %s264_s8 }
  0x10   :  { %v28_v35 = vadd.f32 %v27_v26, %v26_v19  ;;  %v35_v36 = vadd.f32 %v34_v27, %v33_v20  ;;  %v48_v40 = vrot.slane %v47_v31, 2  ;;  %v61_v47 = vadd.f32 %v60_v37, %v59_v30  ;;  %v89_v26 = vld [vmem:[%s510_s1 + $0x8] sm:$0xff]  ;;  %v88_v30 = vld [vmem:[%s510_s1] sm:$0xff]  ;;  %s344_s1 = scalar_lea.vmem %s264_s8, 128 }
  0x11   :  { %v42_v42 = vadd.f32 %v41_v33, %v40_v25  ;;  %v55_v48 = vrot.slane %v54_v39, 2  ;;  %v68_v53 = vadd.f32 %v67_v43, %v66_v38  ;;  %v75_v59 = vadd.f32 %v74_v50, %v73_v44  ;;  %v271_v33 = vld [vmem:[%s511_s2] ss:$0 sm:$0xff]  ;;  %p345_p0 = scmp.ne.s32.totalorder %s264_s8, %s344_s1  ;;  %p350_p2 = scmp.lt.s32.totalorder %s344_s1, %s344_s1 }
  0x12   :  { %315 = vmatpush3.xpose.msk.msra.mxu0 %vm23_vm0, %v99_v10  ;;  %v29_v45 = vrot.slane %v28_v35, 1  ;;  %v36_v46 = vrot.slane %v35_v36, 1  ;;  %v49_v49 = vadd.f32 %v48_v40, %v47_v31  ;;  %v62_v56 = vrot.slane %v61_v47, 2 }
  0x13   :  { %316 = vmatprep.subr.mxu0 %v366_v1  ;;  %v43_v52 = vrot.slane %v42_v42, 1  ;;  %v56_v57 = vadd.f32 %v55_v48, %v54_v39  ;;  %v69_v62 = vrot.slane %v68_v53, 2  ;;  %v76_v5 = vrot.slane %v75_v59, 2  ;;  %p351_p3 = por %p350_p2, %p349_p1 }
  0x14   :  { %v30_v54 = vadd.f32 %v29_v45, %v28_v35  ;;  %v37_v55 = vadd.f32 %v36_v46, %v35_v36  ;;  %v50_v58 = vrot.slane %v49_v49, 1  ;;  %v63_v63 = vadd.f32 %v62_v56, %v61_v47 }
  0x15   :  { %v44_v61 = vadd.f32 %v43_v52, %v42_v42  ;;  %v57_v3 = vrot.slane %v56_v57, 1  ;;  %v70_v7 = vadd.f32 %v69_v62, %v68_v53  ;;  %v77_v12 = vadd.f32 %v76_v5, %v75_v59  ;;  %p352_p4 = pnand %p351_p3, %p345_p0 }
  0x16   :  { %317 = vmatpush3.xpose.msk.msra.mxu0 %vm23_vm0, %v98_v15  ;;  %v80_v0 = vmul.f32 0.125, %v30_v54  ;;  %v81_v2 = vmul.f32 0.125, %v37_v55  ;;  %v51_v4 = vadd.f32 %v50_v58, %v49_v49  ;;  %v64_v9 = vrot.slane %v63_v63, 1 }
  0x17   :  { %318 = vmatprep.subr.mxu0 %v366_v1  ;;  %v82_v8 = vmul.f32 0.125, %v44_v61  ;;  %v58_v11 = vadd.f32 %v57_v3, %v56_v57  ;;  %v71_v15 = vrot.slane %v70_v7, 1  ;;  %v78_v19 = vrot.slane %v77_v12, 1 }
  0x18   :  { %v120_v10 = vsel %vm119_vm2, %v81_v2, %v80_v0  ;;  %v83_v13 = vmul.f32 0.125, %v51_v4  ;;  %v65_v17 = vadd.f32 %v64_v9, %v63_v63  ;;  %vm125_vm5 = vcmask 1044484  }
  0x19   :  { %v122_v16 = vsel %vm121_vm3, %v82_v8, %v120_v10  ;;  %v84_v18 = vmul.f32 0.125, %v58_v11  ;;  %v72_v22 = vadd.f32 %v71_v15, %v70_v7  ;;  %vm127_vm6 = vcmask 1045509  }
  0x1a   :  { %319 = vmatpush3.xpose.msk.msra.mxu0 %vm23_vm0, %v97_v24  ;;  %v124_v20 = vsel %vm123_vm4, %v83_v13, %v122_v16  ;;  %v85_v23 = vmul.f32 0.125, %v65_v17  ;;  %v79_v25 = vadd.f32 %v78_v19, %v77_v12  ;;  %vm129_vm7 = vcmask 1046534  }
  0x1b   :  { %320 = vmatprep.subr.mxu0 %v366_v1  ;;  %v126_v24 = vsel %vm125_vm5, %v84_v18, %v124_v20  ;;  %v86_v27 = vmul.f32 0.125, %v72_v22  ;;  %vm131_vm8 = vcmask 1047559  }
  0x1c   :  { %v128_v28 = vsel %vm127_vm6, %v85_v23, %v126_v24  ;;  %v87_v29 = vmul.f32 0.125, %v79_v25 }
  0x1d   :  { %v130_v31 = vsel %vm129_vm7, %v86_v27, %v128_v28 }
  0x1e   :  { %321 = vmatpush3.xpose.msk.msra.mxu0 %vm23_vm0, %v96_v32  ;;  %v132_v32 = vsel %vm131_vm8, %v87_v29, %v130_v31 }
  0x1f   :  { %322 = vmatprep.subr.mxu0 %v366_v1 }
  0x22   :  { %323 = vmatpush3.xpose.msk.msra.mxu0 %vm23_vm0, %v95_v41 }
  0x23   :  { %324 = vmatprep.subr.mxu0 %v366_v1 }
  0x26   :  { %325 = vmatpush3.xpose.msk.msra.mxu0 %vm23_vm0, %v94_v51 }
  0x27   :  { %326 = vmatprep.subr.mxu0 %v366_v1 }
  0x2a   :  { %327 = vmatpush3.xpose.msk.msra.mxu0 %vm23_vm0, %v93_v60 }
  0x2b   :  { %328 = vmatprep.subr.mxu0 %v366_v1 }
  0x2e   :  { %329 = vmatpush3.xpose.msk.msra.mxu0 %vm23_vm0, %v92_v6 }
  0x2f   :  { %330 = vmatprep.subr.mxu0 %v366_v1 }
  0x32   :  { %331 = vmatpush3.xpose.msk.msra.mxu0 %vm23_vm0, %v91_v14 }
  0x33   :  { %332 = vmatprep.subr.mxu0 %v366_v1 }
  0x36   :  { %333 = vmatpush3.xpose.msk.msra.mxu0 %vm23_vm0, %v90_v21 }
  0x37   :  { %334 = vmatprep.subr.mxu0 %v366_v1 }
  0x3a   :  { %335 = vmatpush3.xpose.msk.msra.mxu0 %vm23_vm0, %v89_v26 }
  0x3b   :  { %336 = vmatprep.subr.mxu0 %v366_v1 }
  0x3e   :  { %337 = vmatpush3.xpose.msk.msra.mxu0 %vm23_vm0, %v88_v30 }
  0x41   :  { %339 = vmatmul.mubr.msk.f32.vlgmr.msra.gmra.mxu0 %vm23_vm0, %v132_v32 }
 0x101   :  { %v249_v34 = vpop.f32.mrf.mxu0 }
 0x102   :  { %v250_v35 = vadd.f32 %v271_v33, %v249_v34 }
 0x103   :  { %v340_v1 = vpop.f32.mrf.mxu0 }
 0x104   :  { %v254_v36 = vmul.f32 0.01, %v250_v35  ;;  %vm253_vm9 = vcmp.gt.f32.partialorder %v250_v35, 0.0 }
 0x106   :  { %v255_v37 = vsel %vm253_vm9, %v250_v35, %v254_v36 }
 0x107   :  { %256 = vst [vmem:[#allocation2] sm:$0xff] %v255_v37 }
 0x108   :  { %355 = shalt.err (!%p352_p4)
}
 0x109   :  { %266 = dma.vmem_to_hbm [thread:$0]  %s264_s8, 128, %s512_s3, [#allocation3]  }
 0x10a   :  { %364 = dma.done.wait [#allocation3], 128  }
 0x10b   :  { %365 = vsyncadd [#allocation3], 4294967168 }
 0x10c   :  { %270 = vsyncpa [#allocation3], 1 }

</bundles_post_ra>
